<compile_context>
chip_gen: v7x
topology: tpu7x:2x2x1
jax: 0.10.0
libtpu: 0.0.40
codegen_flags: <defaults>
</compile_context>

<pallas_src>
import functools

import jax
import jax.numpy as jnp
from jax import lax
from jax.experimental import pallas as pl
from jax.experimental.pallas import tpu as pltpu

_NEG_BIG = -1e30  # plain Python float (finite "-inf") -> becomes a jaxpr literal


def _round_up(a, b):
    return (a + b - 1) // b * b


def _contrastive_loss_kernel(
    x_ref,        # (TM, D) row tile of current
    y_ref,        # (TN, D) col tile of voltage
    out_ref,      # (1, 1)  sum of row LSEs + col LSEs over real rows/cols
    m_row,        # (1, 1)  running scalar max for the current row stripe
    s_row,        # (TM, 1) running row sums exp(logit - m_row)
    m_col,        # (n_col_tiles, 1)  running scalar max per column tile
    s_col,        # (n_col_tiles, TN) running column sums exp(logit - m_col)
    acc_ref,      # (1, 1)  global LSE accumulator
    *, m_actual, padded):
    i = pl.program_id(0)          # row-tile index (outer)
    j = pl.program_id(1)          # col-tile index (inner, fastest)
    n_row = pl.num_programs(0)
    n_col = pl.num_programs(1)
    tm = x_ref.shape[0]
    tn = y_ref.shape[0]

    # ---- one-time init of global accumulators --------------------------------
    @pl.when((i == 0) & (j == 0))
    def _init_global():
        acc_ref[...] = jnp.zeros(acc_ref.shape, jnp.float32)
        m_col[...] = jnp.full(m_col.shape, _NEG_BIG, jnp.float32)
        s_col[...] = jnp.zeros(s_col.shape, jnp.float32)

    # ---- start of a row stripe: reset row stats -------------------------------
    @pl.when(j == 0)
    def _start_stripe():
        m_row[...] = jnp.full(m_row.shape, _NEG_BIG, jnp.float32)
        s_row[...] = jnp.zeros(s_row.shape, jnp.float32)

    # ---- logits tile on the MXU (contraction over D; no transpose of y) -------
    logits = lax.dot_general(
        x_ref[...], y_ref[...],
        dimension_numbers=(((1,), (1,)), ((), ())),
        preferred_element_type=jnp.float32)                      # (TM, TN) f32

    if padded:
        row_ok = (i * tm + lax.broadcasted_iota(jnp.int32, (tm, 1), 0)) < m_actual
        col_ok = (j * tn + lax.broadcasted_iota(jnp.int32, (1, tn), 1)) < m_actual
        logits = jnp.where(row_ok & col_ok, logits, _NEG_BIG)

    # ---- single exp pass, shared tile max --------------------------------------
    # Every tile contains at least one real row and column, so m_t is always finite.
    m_t = jnp.max(jnp.max(logits, axis=1, keepdims=True), axis=0, keepdims=True)  # (1,1)
    e = jnp.exp(logits - m_t)                    # (TM, TN), all exponents <= 0

    # ---- row-wise LSE (online, per-stripe scalar running max) ------------------
    mr_old = m_row[...]                          # (1, 1)
    mr_new = jnp.maximum(mr_old, m_t)
    s_row[...] = (s_row[...] * jnp.exp(mr_old - mr_new)                 # factor <= 1
                  + jnp.sum(e, axis=1, keepdims=True) * jnp.exp(m_t - mr_new))
    m_row[...] = mr_new

    # ---- column-wise LSE (online, per-column-tile scalar running max) ----------
    mc_old = m_col[pl.ds(j, 1), :]               # (1, 1)
    mc_new = jnp.maximum(mc_old, m_t)
    s_col[pl.ds(j, 1), :] = (s_col[pl.ds(j, 1), :] * jnp.exp(mc_old - mc_new)
                             + jnp.sum(e, axis=0, keepdims=True) * jnp.exp(m_t - mc_new))
    m_col[pl.ds(j, 1), :] = mc_new

    # ---- end of a row stripe: fold this stripe's row-wise LSE terms ------------
    @pl.when(j == n_col - 1)
    def _finish_rows():
        row_lse = m_row[...] + jnp.log(s_row[...])               # (TM, 1)
        if padded:
            row_lse_m = jnp.where(row_ok, row_lse, 0.0)          # padded rows -> 0
        else:
            row_lse_m = row_lse
        acc_ref[...] += jnp.sum(row_lse_m, keepdims=True)

    # ---- last row stripe: this column tile's stats are now complete ------------
    @pl.when(i == n_row - 1)
    def _finish_cols():
        col_lse = m_col[pl.ds(j, 1), :] + jnp.log(s_col[pl.ds(j, 1), :])  # (1, TN)
        if padded:
            col_lse_m = jnp.where(col_ok, col_lse, 0.0)          # padded cols -> 0
        else:
            col_lse_m = col_lse
        acc_ref[...] += jnp.sum(col_lse_m, keepdims=True)

    # ---- very last grid step: emit the LSE sum ----------------------------------
    @pl.when((i == n_row - 1) & (j == n_col - 1))
    def _emit():
        out_ref[...] = acc_ref[...]


@functools.partial(jax.jit, static_argnames=("tile_m", "tile_n", "mxu_dtype"))
def contrastive_loss(current, voltage, *, tile_m=None, tile_n=None,
                     mxu_dtype=jnp.float32):
    """Pallas-TPU implementation of ContrastiveLoss.forward(current, voltage)."""
    B, N, D = current.shape
    M = B * N
    cur = current.astype(jnp.float32)
    vol = voltage.astype(jnp.float32)

    # "picked" label logits: labels[r] = r % N.
    #   sum_r logits[r, r % N]  = sum_b sum_n <current[b,n], voltage[0,n]>
    #   sum_c logits[c % N, c]  = sum_b sum_n <current[0,n], voltage[b,n]>
    # Cheap O(M*D) wrapper-side einsums instead of extra in-kernel DMA streams.
    diag_row = jnp.einsum("bnd,nd->", cur, vol[0])
    diag_col = jnp.einsum("nd,bnd->", cur[0], vol)

    # torch.cat([t[i] for i in range(B)]) == reshape(B*N, D)
    x = cur.reshape(M, D).astype(mxu_dtype)      # rows stream
    y = vol.reshape(M, D).astype(mxu_dtype)      # cols stream

    # Rectangular, lane-dense tiles: small TM (row stats are (TM,1)), wide TN.
    if tile_m is None:
        tile_m = min(256, _round_up(M, 8))
    if tile_n is None:
        tile_n = min(512, _round_up(M, 128))
    tile_m = max(8, _round_up(tile_m, 8))
    tile_n = max(128, _round_up(tile_n, 128))

    m_pad_r = _round_up(M, tile_m)
    m_pad_c = _round_up(M, tile_n)
    if m_pad_r != M:
        x = jnp.pad(x, ((0, m_pad_r - M), (0, 0)))
    if m_pad_c != M:
        y = jnp.pad(y, ((0, m_pad_c - M), (0, 0)))
    n_row = m_pad_r // tile_m
    n_col = m_pad_c // tile_n
    padded = (m_pad_r != M) or (m_pad_c != M)

    kernel = functools.partial(_contrastive_loss_kernel,
                               m_actual=M, padded=padded)

    bytes_el = jnp.dtype(mxu_dtype).itemsize
    # Derived VMEM budget: double-buffered input streams + compute temporaries + scratch.
    vmem_est = (2 * (tile_m + tile_n) * D * bytes_el          # x/y double-buffered
                + 4 * tile_m * tile_n * 4                     # logits / e / masks
                + (n_col * (tile_n + 128) + 2 * tile_m + 256) * 4)
    vmem_limit = int(min(max(2 * vmem_est, 16 * 1024 * 1024), 48 * 1024 * 1024))

    lse_sum = pl.pallas_call(
        kernel,
        out_shape=jax.ShapeDtypeStruct((1, 1), jnp.float32),
        grid_spec=pltpu.PrefetchScalarGridSpec(
            num_scalar_prefetch=0,
            grid=(n_row, n_col),
            in_specs=[
                pl.BlockSpec((tile_m, D), lambda i, j: (i, 0)),   # x: row tile
                pl.BlockSpec((tile_n, D), lambda i, j: (j, 0)),   # y: col tile
            ],
            out_specs=pl.BlockSpec((1, 1), lambda i, j: (0, 0)),
            scratch_shapes=[
                pltpu.VMEM((1, 1), jnp.float32),              # m_row (stripe scalar max)
                pltpu.VMEM((tile_m, 1), jnp.float32),         # s_row
                pltpu.VMEM((n_col, 1), jnp.float32),          # m_col (per-col-tile max)
                pltpu.VMEM((n_col, tile_n), jnp.float32),     # s_col (lane-dense, 2-D)
                pltpu.VMEM((1, 1), jnp.float32),              # acc
            ],
        ),
        compiler_params=pltpu.CompilerParams(
            # Both axes touch shared scratch + the scalar accumulator -> sequential.
            dimension_semantics=("arbitrary", "arbitrary"),
            vmem_limit_bytes=vmem_limit,
        ),
        cost_estimate=pl.CostEstimate(
            flops=2 * m_pad_r * m_pad_c * D,
            transcendentals=m_pad_r * m_pad_c + 8 * (m_pad_r + m_pad_c),
            # x streamed once per stripe (resident within it), y re-streamed n_row times.
            bytes_accessed=(m_pad_r * D + n_row * m_pad_c * D) * bytes_el + 4,
        ),
    )(x, y)[0, 0]

    # loss = (CE(logits, labels) + CE(logits.T, labels)) / 2
    #      = (sum(row_lse) + sum(col_lse) - sum(picked_row) - sum(picked_col)) / (2M)
    return (lse_sum - diag_row - diag_col) / (2.0 * M)


def _reference_loss(current, voltage):
    # Pure-JAX reference mirroring the PyTorch forward.
    B, N, D = current.shape
    M = B * N
    x = current.reshape(M, D).astype(jnp.float32)
    y = voltage.reshape(M, D).astype(jnp.float32)
    logits = x @ y.T
    labels = jnp.tile(jnp.arange(N), B)
    lp_row = jax.nn.log_softmax(logits, axis=1)
    lp_col = jax.nn.log_softmax(logits.T, axis=1)
    l1 = -jnp.mean(lp_row[jnp.arange(M), labels])
    l2 = -jnp.mean(lp_col[jnp.arange(M), labels])
    return (l1 + l2) / 2


if __name__ == "__main__":
    key = jax.random.PRNGKey(0)
    k1, k2, k3, k4 = jax.random.split(key, 4)

    # Small shape implied by the module: batch=2, num_cmg=4, feature dim=32.
    B, N, D = 2, 4, 32
    current = jax.random.normal(k1, (B, N, D), dtype=jnp.float32)
    voltage = jax.random.normal(k2, (B, N, D), dtype=jnp.float32)
    loss = contrastive_loss(current, voltage)
    jax.block_until_ready(loss)
    ref = _reference_loss(current, voltage)
    assert jnp.allclose(loss, ref, rtol=1e-5, atol=1e-5), (loss, ref)

    # Multi-tile 3x3 grid with padded rows/cols (M=300 -> 384 with 128x128 tiles).
    B2, N2, D2 = 3, 100, 32
    current2 = jax.random.normal(k3, (B2, N2, D2), dtype=jnp.float32)
    voltage2 = jax.random.normal(k4, (B2, N2, D2), dtype=jnp.float32)
    loss2 = contrastive_loss(current2, voltage2, tile_m=128, tile_n=128)
    jax.block_until_ready(loss2)
    ref2 = _reference_loss(current2, voltage2)
    assert jnp.allclose(loss2, ref2, rtol=1e-4, atol=1e-4), (loss2, ref2)

    # bf16 MXU operands (f32 accumulation / stats): faster matmul path, looser tolerance.
    loss3 = contrastive_loss(current2, voltage2, mxu_dtype=jnp.bfloat16)
    jax.block_until_ready(loss3)
    assert jnp.allclose(loss3, ref2, rtol=5e-2, atol=5e-2), (loss3, ref2)

    print("KERNEL_OK")
</pallas_src>

<mosaic_0001>
module attributes {stable_mosaic.version = 11 : i64} {
  func.func @_contrastive_loss_kernel(%arg0: i32, %arg1: i32, %arg2: memref<8x32xf32, #tpu.memory_space<vmem>>, %arg3: memref<128x32xf32, #tpu.memory_space<vmem>>, %arg4: memref<1x1xf32, #tpu.memory_space<vmem>>, %arg5: memref<1x1xf32, #tpu.memory_space<vmem>>, %arg6: memref<8x1xf32, #tpu.memory_space<vmem>>, %arg7: memref<1x1xf32, #tpu.memory_space<vmem>>, %arg8: memref<1x128xf32, #tpu.memory_space<vmem>>, %arg9: memref<1x1xf32, #tpu.memory_space<vmem>>) attributes {dimension_semantics = [#tpu.dimension_semantics<arbitrary>, #tpu.dimension_semantics<arbitrary>], iteration_bounds = array<i64: 1, 1>, scalar_prefetch = 0 : i64, scratch_operands = 5 : i64, tpu.core_type = #tpu.core_type<tc>, window_params = [{transform_indices = @transform_0, window_bounds = array<i64: 8, 32>}, {transform_indices = @transform_1, window_bounds = array<i64: 128, 32>}, {pipeline_mode = #tpu.pipeline_mode<synchronous>, transform_indices = @transform_2, window_bounds = array<i64: 1, 1>}]} {
    %c0_i32 = arith.constant 0 : i32
    %0 = arith.cmpi eq, %arg0, %c0_i32 : i32
    %c0_i32_0 = arith.constant 0 : i32
    %1 = arith.cmpi eq, %arg1, %c0_i32_0 : i32
    %2 = arith.andi %0, %1 : i1
    %3 = arith.extui %2 : i1 to i32
    %c0_i32_1 = arith.constant 0 : i32
    %4 = arith.cmpi ne, %3, %c0_i32_1 : i32
    scf.if %4 {
      %cst_33 = arith.constant 0.000000e+00 : f32
      %82 = vector.broadcast %cst_33 : f32 to vector<1x1xf32>
      %c0_34 = arith.constant 0 : index
      %c0_35 = arith.constant 0 : index
      %83 = vector.load %arg9[%c0_34, %c0_35] : memref<1x1xf32, #tpu.memory_space<vmem>>, vector<1x1xf32>
      tpu.vector_store %arg9[%c0_34, %c0_35], %82 {strides = array<i32>} : memref<1x1xf32, #tpu.memory_space<vmem>>, vector<1x1xf32>,
      %cst_36 = arith.constant -1.000000e+30 : f32
      %84 = vector.broadcast %cst_36 : f32 to vector<1x1xf32>
      %c0_37 = arith.constant 0 : index
      %c0_38 = arith.constant 0 : index
      %85 = vector.load %arg7[%c0_37, %c0_38] : memref<1x1xf32, #tpu.memory_space<vmem>>, vector<1x1xf32>
      tpu.vector_store %arg7[%c0_37, %c0_38], %84 {strides = array<i32>} : memref<1x1xf32, #tpu.memory_space<vmem>>, vector<1x1xf32>,
      %cst_39 = arith.constant 0.000000e+00 : f32
      %86 = vector.broadcast %cst_39 : f32 to vector<1x128xf32>
      %c0_40 = arith.constant 0 : index
      %c0_41 = arith.constant 0 : index
      %87 = vector.load %arg8[%c0_40, %c0_41] : memref<1x128xf32, #tpu.memory_space<vmem>>, vector<1x128xf32>
      tpu.vector_store %arg8[%c0_40, %c0_41], %86 {strides = array<i32>} : memref<1x128xf32, #tpu.memory_space<vmem>>, vector<1x128xf32>,
    } else {
    }
    %c0_i32_2 = arith.constant 0 : i32
    %5 = arith.cmpi eq, %arg1, %c0_i32_2 : i32
    %6 = arith.extui %5 : i1 to i32
    %c0_i32_3 = arith.constant 0 : i32
    %7 = arith.cmpi ne, %6, %c0_i32_3 : i32
    scf.if %7 {
      %cst_33 = arith.constant -1.000000e+30 : f32
      %82 = vector.broadcast %cst_33 : f32 to vector<1x1xf32>
      %c0_34 = arith.constant 0 : index
      %c0_35 = arith.constant 0 : index
      %83 = vector.load %arg5[%c0_34, %c0_35] : memref<1x1xf32, #tpu.memory_space<vmem>>, vector<1x1xf32>
      tpu.vector_store %arg5[%c0_34, %c0_35], %82 {strides = array<i32>} : memref<1x1xf32, #tpu.memory_space<vmem>>, vector<1x1xf32>,
      %cst_36 = arith.constant 0.000000e+00 : f32
      %84 = vector.broadcast %cst_36 : f32 to vector<8x1xf32>
      %c0_37 = arith.constant 0 : index
      %c0_38 = arith.constant 0 : index
      %85 = vector.load %arg6[%c0_37, %c0_38] : memref<8x1xf32, #tpu.memory_space<vmem>>, vector<8x1xf32>
      tpu.vector_store %arg6[%c0_37, %c0_38], %84 {strides = array<i32>} : memref<8x1xf32, #tpu.memory_space<vmem>>, vector<8x1xf32>,
    } else {
    }
    %c0 = arith.constant 0 : index
    %c0_4 = arith.constant 0 : index
    %8 = vector.load %arg2[%c0, %c0_4] : memref<8x32xf32, #tpu.memory_space<vmem>>, vector<8x32xf32>
    %c0_5 = arith.constant 0 : index
    %c0_6 = arith.constant 0 : index
    %9 = vector.load %arg3[%c0_5, %c0_6] : memref<128x32xf32, #tpu.memory_space<vmem>>, vector<128x32xf32>
    %cst = arith.constant dense<0.000000e+00> : vector<8x128xf32>
    %10 = tpu.matmul %8, %9, %cst {dimension_numbers = #tpu.dot_dimension_numbers<[1], [1], [0], [0], [0, 0, 1, 0], [], []>} : vector<8x32xf32>, vector<128x32xf32>, vector<8x128xf32> -> vector<8x128xf32>
    %c8_i32 = arith.constant 8 : i32
    %11 = arith.muli %arg0, %c8_i32 : i32
    %12 = tpu.iota {dimensions = array<i32: 0>} : vector<8x1xi32>
    %13 = vector.broadcast %11 : i32 to vector<8x1xi32>
    %14 = arith.addi %13, %12 : vector<8x1xi32>
    %c8_i32_7 = arith.constant 8 : i32
    %15 = vector.broadcast %c8_i32_7 : i32 to vector<8x1xi32>
    %16 = arith.cmpi slt, %14, %15 : vector<8x1xi32>
    %c128_i32 = arith.constant 128 : i32
    %17 = arith.muli %arg1, %c128_i32 : i32
    %18 = tpu.iota {dimensions = array<i32: 1>} : vector<1x128xi32>
    %19 = vector.broadcast %17 : i32 to vector<1x128xi32>
    %20 = arith.addi %19, %18 : vector<1x128xi32>
    %c8_i32_8 = arith.constant 8 : i32
    %21 = vector.broadcast %c8_i32_8 : i32 to vector<1x128xi32>
    %22 = arith.cmpi slt, %20, %21 : vector<1x128xi32>
    %23 = vector.broadcast %16 : vector<8x1xi1> to vector<8x128xi1>
    %24 = vector.broadcast %22 : vector<1x128xi1> to vector<8x128xi1>
    %25 = arith.andi %23, %24 : vector<8x128xi1>
    %cst_9 = arith.constant -1.000000e+30 : f32
    %26 = vector.broadcast %cst_9 : f32 to vector<8x128xf32>
    %27 = arith.select %25, %10, %26 : vector<8x128xi1>, vector<8x128xf32>
    %cst_10 = arith.constant dense<0xFF800000> : vector<8xf32>
    %28 = vector.multi_reduction <maximumf>, %27, %cst_10 [1] : vector<8x128xf32> to vector<8xf32>
    %29 = vector.shape_cast %28 : vector<8xf32> to vector<8x1xf32>
    %cst_11 = arith.constant dense<0xFF800000> : vector<1xf32>
    %30 = vector.multi_reduction <maximumf>, %29, %cst_11 [0] : vector<8x1xf32> to vector<1xf32>
    %31 = vector.shape_cast %30 : vector<1xf32> to vector<1x1xf32>
    %32 = vector.broadcast %31 : vector<1x1xf32> to vector<8x128xf32>
    %33 = arith.subf %27, %32 : vector<8x128xf32>
    %34 = math.exp %33 : vector<8x128xf32>
    %c0_12 = arith.constant 0 : index
    %c0_13 = arith.constant 0 : index
    %35 = vector.load %arg5[%c0_12, %c0_13] : memref<1x1xf32, #tpu.memory_space<vmem>>, vector<1x1xf32>
    %36 = arith.maximumf %35, %31 : vector<1x1xf32>
    %c0_14 = arith.constant 0 : index
    %c0_15 = arith.constant 0 : index
    %37 = vector.load %arg6[%c0_14, %c0_15] : memref<8x1xf32, #tpu.memory_space<vmem>>, vector<8x1xf32>
    %38 = arith.subf %35, %36 : vector<1x1xf32>
    %39 = math.exp %38 : vector<1x1xf32>
    %40 = vector.broadcast %39 : vector<1x1xf32> to vector<8x1xf32>
    %41 = arith.mulf %37, %40 : vector<8x1xf32>
    %cst_16 = arith.constant dense<0.000000e+00> : vector<8xf32>
    %42 = vector.multi_reduction <add>, %34, %cst_16 [1] : vector<8x128xf32> to vector<8xf32>
    %43 = vector.shape_cast %42 : vector<8xf32> to vector<8x1xf32>
    %44 = arith.subf %31, %36 : vector<1x1xf32>
    %45 = math.exp %44 : vector<1x1xf32>
    %46 = vector.broadcast %45 : vector<1x1xf32> to vector<8x1xf32>
    %47 = arith.mulf %43, %46 : vector<8x1xf32>
    %48 = arith.addf %41, %47 : vector<8x1xf32>
    %c0_17 = arith.constant 0 : index
    %c0_18 = arith.constant 0 : index
    %49 = vector.load %arg6[%c0_17, %c0_18] : memref<8x1xf32, #tpu.memory_space<vmem>>, vector<8x1xf32>
    tpu.vector_store %arg6[%c0_17, %c0_18], %48 {strides = array<i32>} : memref<8x1xf32, #tpu.memory_space<vmem>>, vector<8x1xf32>,
    %c0_19 = arith.constant 0 : index
    %c0_20 = arith.constant 0 : index
    %50 = vector.load %arg5[%c0_19, %c0_20] : memref<1x1xf32, #tpu.memory_space<vmem>>, vector<1x1xf32>
    tpu.vector_store %arg5[%c0_19, %c0_20], %36 {strides = array<i32>} : memref<1x1xf32, #tpu.memory_space<vmem>>, vector<1x1xf32>,
    %51 = arith.index_cast %arg1 : i32 to index
    %c0_21 = arith.constant 0 : index
    %52 = vector.load %arg7[%51, %c0_21] : memref<1x1xf32, #tpu.memory_space<vmem>>, vector<1x1xf32>
    %53 = arith.maximumf %52, %31 : vector<1x1xf32>
    %54 = arith.index_cast %arg1 : i32 to index
    %c0_22 = arith.constant 0 : index
    %55 = vector.load %arg8[%54, %c0_22] : memref<1x128xf32, #tpu.memory_space<vmem>>, vector<1x128xf32>
    %56 = arith.subf %52, %53 : vector<1x1xf32>
    %57 = math.exp %56 : vector<1x1xf32>
    %58 = vector.broadcast %57 : vector<1x1xf32> to vector<1x128xf32>
    %59 = arith.mulf %55, %58 : vector<1x128xf32>
    %cst_23 = arith.constant dense<0.000000e+00> : vector<128xf32>
    %60 = vector.multi_reduction <add>, %34, %cst_23 [0] : vector<8x128xf32> to vector<128xf32>
    %61 = vector.shape_cast %60 : vector<128xf32> to vector<1x128xf32>
    %62 = arith.subf %31, %53 : vector<1x1xf32>
    %63 = math.exp %62 : vector<1x1xf32>
    %64 = vector.broadcast %63 : vector<1x1xf32> to vector<1x128xf32>
    %65 = arith.mulf %61, %64 : vector<1x128xf32>
    %66 = arith.addf %59, %65 : vector<1x128xf32>
    %67 = arith.index_cast %arg1 : i32 to index
    %c0_24 = arith.constant 0 : index
    %68 = vector.load %arg8[%67, %c0_24] : memref<1x128xf32, #tpu.memory_space<vmem>>, vector<1x128xf32>
    tpu.vector_store %arg8[%67, %c0_24], %66 {strides = array<i32>} : memref<1x128xf32, #tpu.memory_space<vmem>>, vector<1x128xf32>,
    %69 = arith.index_cast %arg1 : i32 to index
    %c0_25 = arith.constant 0 : index
    %70 = vector.load %arg7[%69, %c0_25] : memref<1x1xf32, #tpu.memory_space<vmem>>, vector<1x1xf32>
    tpu.vector_store %arg7[%69, %c0_25], %53 {strides = array<i32>} : memref<1x1xf32, #tpu.memory_space<vmem>>, vector<1x1xf32>,
    %c0_i32_26 = arith.constant 0 : i32
    %71 = arith.cmpi eq, %arg1, %c0_i32_26 : i32
    %72 = arith.extui %71 : i1 to i32
    %c0_i32_27 = arith.constant 0 : i32
    %73 = arith.cmpi ne, %72, %c0_i32_27 : i32
    scf.if %73 {
      %c0_33 = arith.constant 0 : index
      %c0_34 = arith.constant 0 : index
      %82 = vector.load %arg5[%c0_33, %c0_34] : memref<1x1xf32, #tpu.memory_space<vmem>>, vector<1x1xf32>
      %c0_35 = arith.constant 0 : index
      %c0_36 = arith.constant 0 : index
      %83 = vector.load %arg6[%c0_35, %c0_36] : memref<8x1xf32, #tpu.memory_space<vmem>>, vector<8x1xf32>
      %84 = math.log %83 : vector<8x1xf32>
      %85 = vector.broadcast %82 : vector<1x1xf32> to vector<8x1xf32>
      %86 = arith.addf %85, %84 : vector<8x1xf32>
      %cst_37 = arith.constant 0.000000e+00 : f32
      %87 = vector.broadcast %cst_37 : f32 to vector<8x1xf32>
      %88 = arith.select %16, %86, %87 : vector<8x1xi1>, vector<8x1xf32>
      %c0_38 = arith.constant 0 : index
      %c0_39 = arith.constant 0 : index
      %89 = vector.load %arg9[%c0_38, %c0_39] : memref<1x1xf32, #tpu.memory_space<vmem>>, vector<1x1xf32>
      %90 = vector.shape_cast %88 : vector<8x1xf32> to vector<1x8x1xf32>
      %cst_40 = arith.constant dense<0.000000e+00> : vector<1xf32>
      %91 = vector.multi_reduction <add>, %90, %cst_40 [1, 2] : vector<1x8x1xf32> to vector<1xf32>
      %92 = vector.shape_cast %91 : vector<1xf32> to vector<1x1x1xf32>
      %93 = vector.extract %92[0, 0, 0] : f32 from vector<1x1x1xf32>
      %94 = vector.broadcast %93 : f32 to vector<1x1xf32>
      %95 = arith.addf %89, %94 : vector<1x1xf32>
      %c0_41 = arith.constant 0 : index
      %c0_42 = arith.constant 0 : index
      %96 = vector.load %arg9[%c0_41, %c0_42] : memref<1x1xf32, #tpu.memory_space<vmem>>, vector<1x1xf32>
      tpu.vector_store %arg9[%c0_41, %c0_42], %95 {strides = array<i32>} : memref<1x1xf32, #tpu.memory_space<vmem>>, vector<1x1xf32>,
    } else {
    }
    %c0_i32_28 = arith.constant 0 : i32
    %74 = arith.cmpi eq, %arg0, %c0_i32_28 : i32
    %75 = arith.extui %74 : i1 to i32
    %c0_i32_29 = arith.constant 0 : i32
    %76 = arith.cmpi ne, %75, %c0_i32_29 : i32
    scf.if %76 {
      %82 = arith.index_cast %arg1 : i32 to index
      %c0_33 = arith.constant 0 : index
      %83 = vector.load %arg7[%82, %c0_33] : memref<1x1xf32, #tpu.memory_space<vmem>>, vector<1x1xf32>
      %84 = arith.index_cast %arg1 : i32 to index
      %c0_34 = arith.constant 0 : index
      %85 = vector.load %arg8[%84, %c0_34] : memref<1x128xf32, #tpu.memory_space<vmem>>, vector<1x128xf32>
      %86 = math.log %85 : vector<1x128xf32>
      %87 = vector.broadcast %83 : vector<1x1xf32> to vector<1x128xf32>
      %88 = arith.addf %87, %86 : vector<1x128xf32>
      %cst_35 = arith.constant 0.000000e+00 : f32
      %89 = vector.broadcast %cst_35 : f32 to vector<1x128xf32>
      %90 = arith.select %22, %88, %89 : vector<1x128xi1>, vector<1x128xf32>
      %c0_36 = arith.constant 0 : index
      %c0_37 = arith.constant 0 : index
      %91 = vector.load %arg9[%c0_36, %c0_37] : memref<1x1xf32, #tpu.memory_space<vmem>>, vector<1x1xf32>
      %92 = vector.shape_cast %90 : vector<1x128xf32> to vector<1x1x128xf32>
      %cst_38 = arith.constant dense<0.000000e+00> : vector<1xf32>
      %93 = vector.multi_reduction <add>, %92, %cst_38 [1, 2] : vector<1x1x128xf32> to vector<1xf32>
      %94 = vector.shape_cast %93 : vector<1xf32> to vector<1x1x1xf32>
      %95 = vector.extract %94[0, 0, 0] : f32 from vector<1x1x1xf32>
      %96 = vector.broadcast %95 : f32 to vector<1x1xf32>
      %97 = arith.addf %91, %96 : vector<1x1xf32>
      %c0_39 = arith.constant 0 : index
      %c0_40 = arith.constant 0 : index
      %98 = vector.load %arg9[%c0_39, %c0_40] : memref<1x1xf32, #tpu.memory_space<vmem>>, vector<1x1xf32>
      tpu.vector_store %arg9[%c0_39, %c0_40], %97 {strides = array<i32>} : memref<1x1xf32, #tpu.memory_space<vmem>>, vector<1x1xf32>,
    } else {
    }
    %c0_i32_30 = arith.constant 0 : i32
    %77 = arith.cmpi eq, %arg0, %c0_i32_30 : i32
    %c0_i32_31 = arith.constant 0 : i32
    %78 = arith.cmpi eq, %arg1, %c0_i32_31 : i32
    %79 = arith.andi %77, %78 : i1
    %80 = arith.extui %79 : i1 to i32
    %c0_i32_32 = arith.constant 0 : i32
    %81 = arith.cmpi ne, %80, %c0_i32_32 : i32
    scf.if %81 {
      %c0_33 = arith.constant 0 : index
      %c0_34 = arith.constant 0 : index
      %82 = vector.load %arg9[%c0_33, %c0_34] : memref<1x1xf32, #tpu.memory_space<vmem>>, vector<1x1xf32>
      %c0_35 = arith.constant 0 : index
      %c0_36 = arith.constant 0 : index
      %83 = vector.load %arg4[%c0_35, %c0_36] : memref<1x1xf32, #tpu.memory_space<vmem>>, vector<1x1xf32>
      tpu.vector_store %arg4[%c0_35, %c0_36], %82 {strides = array<i32>} : memref<1x1xf32, #tpu.memory_space<vmem>>, vector<1x1xf32>,
    } else {
    }
    return
  }
  func.func @transform_0(%arg0: i32, %arg1: i32) -> (i32, i32) {
    %c0_i32 = arith.constant 0 : i32
    %c0_i32_0 = arith.constant 0 : i32
    return %arg0, %c0_i32 : i32, i32
  }
  func.func @transform_1(%arg0: i32, %arg1: i32) -> (i32, i32) {
    %c0_i32 = arith.constant 0 : i32
    %c0_i32_0 = arith.constant 0 : i32
    return %arg1, %c0_i32 : i32, i32
  }
  func.func @transform_2(%arg0: i32, %arg1: i32) -> (i32, i32) {
    %c0_i32 = arith.constant 0 : i32
    %c0_i32_0 = arith.constant 0 : i32
    %c0_i32_1 = arith.constant 0 : i32
    return %c0_i32, %c0_i32_0 : i32, i32
  }
}

</mosaic_0001>

<bundles_post_ra>
// kernel: contrastive_loss.1
= control target key start
LH: loop header
LB: loop body
LE: loop exit
PB: predicated region body
PF: predicated region fallthrough
CT: control target
= control target key end

     0   :  { %vm46_vm0 = vcmask 261120   ;;  %v497_v2 = vmov 0.0|0.0   ;;  %vm18_vm2 = vcmask 0   ;;  %v498_v5 = vmov 0.0   ;;  %s622_s0 = inlined_call_operand.vmem [shape: f32[8,32], index: 0, kind: input, shape index: {}]   ;;  %s623_s1 = inlined_call_operand.vmem [shape: f32[128,32], index: 1, kind: input, shape index: {}]   ;;  %s624_s2 = inlined_call_operand.hbm [shape: f32[1,1], index: 2, kind: output, shape index: {}]  }
   0x1   :  { %v30_v0 = vld [vmem:[%s623_s1] sm:$0xff]  ;;  %v31_v1 = vld [vmem:[%s623_s1 + $0x8] sm:$0xff]  ;;  %415 = vmatprep.subr.bf16.mxu0 %v497_v2  ;;  %vm526_vm1 = vmpackc.low %vm46_vm0, %vm46_vm0  ;;  %19 = vst.msk [vmem:[#allocation6] sm:$0x1] %vm18_vm2, %v498_v5  ;;  %vm499_vm3 = vmmov 0  }
   0x2   :  { %v416_v3 = vpack.c.bf16 %v31_v1, %v30_v0  ;;  %21 = vst [vmem:[#allocation5] sm:$0x1] %v498_v5  ;;  %412 = vmatprep.mubr.msk.f32.mxu0 %vm499_vm3, %v498_v5  ;;  %v32_v6 = vld [vmem:[%s623_s1 + $0x10] sm:$0xff]  ;;  %v33_v7 = vld [vmem:[%s623_s1 + $0x18] sm:$0xff] }
   0x4   :  { %418 = vmatpush3.bf16.xpose.msk.msra.mxu0 %vm526_vm1, %v416_v3 }
   0x5   :  { %419 = vmatprep.subr.bf16.mxu0 %v497_v2 }
   0x6   :  { %7 = vsyncpa [#allocation8], 0  ;;  %v420_v8 = vpack.c.bf16 %v33_v7, %v32_v6  ;;  %v34_v9 = vld [vmem:[%s623_s1 + $0x20] sm:$0xff]  ;;  %v35_v10 = vld [vmem:[%s623_s1 + $0x28] sm:$0xff]  ;;  %v500_v28 = vmov -1e+30   ;;  %v175_v29 = vlaneseq }
   0x7   :  { %v424_v11 = vpack.c.bf16 %v35_v10, %v34_v9  ;;  %v36_v12 = vld [vmem:[%s623_s1 + $0x30] sm:$0xff]  ;;  %v37_v13 = vld [vmem:[%s623_s1 + $0x38] sm:$0xff]  ;;  %v38_v15 = vld [vmem:[%s623_s1 + $0x40] sm:$0xff]  ;;  %26 = vst.msk [vmem:[#allocation2] sm:$0x1] %vm18_vm2, %v500_v28  ;;  %vm27_vm5 = vcmask 7168  }
   0x8   :  { %v428_v14 = vpack.c.bf16 %v37_v13, %v36_v12  ;;  %v39_v16 = vld [vmem:[%s623_s1 + $0x48] sm:$0xff]  ;;  %v40_v18 = vld [vmem:[%s623_s1 + $0x50] sm:$0xff]  ;;  %v41_v19 = vld [vmem:[%s623_s1 + $0x58] sm:$0xff]  ;;  %20 = vst.msk [vmem:[#allocation4] sm:$0x1] %vm18_vm2, %v500_v28  ;;  %v595_v30 = vand.u32 127, %v175_v29 }
   0x9   :  { %v432_v17 = vpack.c.bf16 %v39_v16, %v38_v15  ;;  %v436_v20 = vpack.c.bf16 %v41_v19, %v40_v18  ;;  %v42_v21 = vld [vmem:[%s623_s1 + $0x60] sm:$0xff]  ;;  %v43_v22 = vld [vmem:[%s623_s1 + $0x68] sm:$0xff]  ;;  %v44_v24 = vld [vmem:[%s623_s1 + $0x70] sm:$0xff]  ;;  %28 = vst.msk [vmem:[#allocation3] sm:$0xff] %vm27_vm5, %v498_v5  ;;  %v501_v34 = vmov 0   ;;  %v205_v56 = vshrl.u32 %v175_v29, 7 }
   0xa   :  { %v440_v23 = vpack.c.bf16 %v43_v22, %v42_v21  ;;  %v45_v25 = vld [vmem:[%s623_s1 + $0x78] sm:$0xff]  ;;  %v29_v27 = vld [vmem:[%s622_s0] sm:$0xff]  ;;  %vm179_vm4 = vcmp.lt.s32.totalorder %v595_v30, 8  ;;  %457 = vset.pattern.permute.xlu1 %v501_v34  ;;  %458 = vset.pattern.permute.xlu0 %v501_v34  ;;  %v229_v9 = vld [vmem:[#allocation5] sm:$0x1]  ;;  %vm313_vm6 = vcmask 1040384  }
   0xb   :  { %v444_v26 = vpack.c.bf16 %v45_v25, %v44_v24  ;;  %v206_v58 = vsub.s32 0, %v205_v56  ;;  %v280_v30 = vld [vmem:[#allocation6] sm:$0x1]  ;;  %s502_s15 = smov [#allocation7]  }
   0xc   :  { %422 = vmatpush3.bf16.xpose.msk.msra.mxu0 %vm526_vm1, %v420_v8  ;;  %s337_s16 = sshll.u32 %s502_s15, 4  ;;  %s338_s16 = int_to_ptr.vmem [resolvable:$true] %s337_s16 }
   0xd   :  { %423 = vmatprep.subr.bf16.mxu0 %v497_v2  ;;  %s473_s17 = scalar_lea.vmem %s338_s16, 16  ;;  %s477_s18 = scalar_lea.vmem %s338_s16, 32 }
   0xe   :  { %v197_v41 = vld [vmem:[#allocation2] sm:$0x1]  ;;  %p474_p0 = scmp.ne.s32.totalorder %s338_s16, %s473_s17  ;;  %p478_p1 = scmp.lt.s32.totalorder %s338_s16, %s338_s16 }
   0xf   :  { %v227_v42 = vld [vmem:[#allocation4] sm:$0x1]  ;;  %p479_p2 = scmp.lt.s32.totalorder %s477_s18, %s473_s17 }
  0x10   :  { %v199_v16 = vld [vmem:[#allocation3] sm:$0xff] }
  0x11   :  { %p480_p3 = por %p479_p2, %p478_p1 }
  0x13   :  { %p481_p4 = pnand %p480_p3, %p474_p0 }
  0x14   :  { %426 = vmatpush3.bf16.xpose.msk.msra.mxu0 %vm526_vm1, %v424_v11 }
  0x15   :  { %427 = vmatprep.subr.bf16.mxu0 %v497_v2 }
  0x1c   :  { %430 = vmatpush3.bf16.xpose.msk.msra.mxu0 %vm526_vm1, %v428_v14 }
  0x1d   :  { %431 = vmatprep.subr.bf16.mxu0 %v497_v2 }
  0x24   :  { %434 = vmatpush3.bf16.xpose.msk.msra.mxu0 %vm526_vm1, %v432_v17 }
  0x25   :  { %435 = vmatprep.subr.bf16.mxu0 %v497_v2 }
  0x2c   :  { %438 = vmatpush3.bf16.xpose.msk.msra.mxu0 %vm526_vm1, %v436_v20 }
  0x2d   :  { %439 = vmatprep.subr.bf16.mxu0 %v497_v2 }
  0x34   :  { %442 = vmatpush3.bf16.xpose.msk.msra.mxu0 %vm526_vm1, %v440_v23 }
  0x35   :  { %443 = vmatprep.subr.bf16.mxu0 %v497_v2 }
  0x3c   :  { %446 = vmatpush3.bf16.xpose.msk.msra.mxu0 %vm526_vm1, %v444_v26 }
  0x43   :  { %413 = vmatmul.mubr.msk.f32.vlgmr.msra.gmra.mrb[0].mxu0 %vm46_vm0, %v29_v27 }
 0x116   :  { %v164_v31 = vpop.f32.mrb[0].mxu0 }
 0x117   :  { %v414_v32 = vpop.f32.mrb[1].mxu0  ;;  %v185_v33 = vsel %vm179_vm4, %v164_v31, -1e+30 }
 0x118   :  { %186 = vmax.xlane.f32.xlu0 %v185_v33 }
 0x1a5   :  { %v187_v35 = vpop.xlane.xlu0 %186 }
 0x1a6   :  { %v188_v36 = vrot.slane %v187_v35, 4 }
 0x1a8   :  { %v189_v37 = vmax.f32 %v187_v35, %v188_v36 }
 0x1aa   :  { %v190_v38 = vrot.slane %v189_v37, 2 }
 0x1ac   :  { %v191_v39 = vmax.f32 %v189_v37, %v190_v38 }
 0x1ae   :  { %v192_v40 = vrot.slane %v191_v39, 1 }
 0x1b0   :  { %v193_v43 = vmax.f32 %v191_v39, %v192_v40 }
 0x1b2   :  { %v194_v44 = vsub.f32 %v185_v33, %v193_v43  ;;  %v198_v45 = vmax.f32 %v197_v41, %v193_v43  ;;  %v228_v46 = vmax.f32 %v227_v42, %v193_v43 }
 0x1b4   :  { %v195_v47 = vmul.f32 1.442695, %v194_v44  ;;  %226 = vst.msk [vmem:[#allocation2] sm:$0x1] %vm18_vm2, %v198_v45  ;;  %v230_v48 = vsub.f32 %v227_v42, %v228_v46  ;;  %v249_v49 = vsub.f32 %v193_v43, %v228_v46  ;;  %264 = vst.msk [vmem:[#allocation4] sm:$0x1] %vm18_vm2, %v228_v46  ;;  %v200_v50 = vsub.f32 %v197_v41, %v198_v45 }
 0x1b5   :  { %v212_v51 = vsub.f32 %v193_v43, %v198_v45 }
 0x1b6   :  { %459 = vpow2.f32 %v195_v47  ;;  %v231_v52 = vmul.f32 1.442695, %v230_v48  ;;  %v201_v53 = vmul.f32 1.442695, %v200_v50  ;;  %v250_v55 = vmul.f32 1.442695, %v249_v49 }
 0x1b7   :  { %v213_v54 = vmul.f32 1.442695, %v212_v51 }
 0x1b8   :  { %461 = vpow2.f32 %v231_v52 }
 0x1b9   :  { %463 = vpow2.f32 %v201_v53 }
 0x1ba   :  { %465 = vpow2.f32 %v213_v54 }
 0x1bb   :  { %467 = vpow2.f32 %v250_v55  ;;  %v297_v1 = vld [vmem:[#allocation4] sm:$0x1]  ;;  %v362_v31 = vld [vmem:[#allocation2] ss:$0 sm:$0xff] }
 0x1c0   :  { %v460_v57 = vpop.eup %459 }
 0x1c1   :  { %210 = vadd.xlane.f32.xlu0 %v460_v57  ;;  %v243_v2 = vrot.slane %v460_v57, 4 }
 0x1c2   :  { %v462_v59 = vpop.eup %461 }
 0x1c3   :  { %235 = vperm.xlu1 %457, %v462_v59   ;;  %v464_v60 = vpop.eup %463  ;;  %v244_v3 = vadd.f32 %v460_v57, %v243_v2 }
 0x1c4   :  { %v466_v61 = vpop.eup %465  ;;  %v207_v62 = vrot.slane %v464_v60, %v206_v58 }
 0x1c5   :  { %v468_v63 = vpop.eup %467  ;;  %v219_v0 = vrot.slane %v466_v61, %v206_v58  ;;  %v245_v4 = vrot.slane %v244_v3, 2 }
 0x1c6   :  { %v209_v18 = vmul.f32 %v207_v62, %v199_v16 }
 0x1c7   :  { %254 = vperm.xlu1 %457, %v468_v63   ;;  %v246_v5 = vadd.f32 %v245_v4, %v244_v3 }
 0x1c9   :  { %v247_v7 = vrot.slane %v246_v5, 1 }
 0x1cb   :  { %v248_v11 = vadd.f32 %v247_v7, %v246_v5 }
 0x1d7   :  { %303 = vperm.xlu0 %458, %v297_v1  }
 0x242   :  { %v236_v6 = vpop.permute.xlu1 %235 }
 0x243   :  { %v241_v8 = vrot.slane %v236_v6, %v206_v58 }
 0x245   :  { %v242_v13 = vmul.f32 %v241_v8, %v229_v9 }
 0x246   :  { %v255_v10 = vpop.permute.xlu1 %254 }
 0x247   :  { %v260_v12 = vrot.slane %v255_v10, %v206_v58 }
 0x249   :  { %v261_v14 = vmul.f32 %v260_v12, %v248_v11 }
 0x24b   :  { %v262_v15 = vadd.f32 %v261_v14, %v242_v13 }
 0x24d   :  { %263 = vst [vmem:[#allocation5] sm:$0x1] %v262_v15 }
 0x24e   :  { %v211_v17 = vpop.xlane.xlu0 %210 }
 0x24f   :  { %v221_v19 = vmul.f32 %v219_v0, %v211_v17 }
 0x251   :  { %v222_v20 = vadd.f32 %v221_v19, %v209_v18 }
 0x253   :  { %224 = vst.msk [vmem:[#allocation3] sm:$0xff] %vm27_vm5, %v222_v20 }
 0x254   :  { %v298_v21 = vld [vmem:[#allocation5] sm:$0x1] }
 0x255   :  { %469 = vlog2.f32 %v298_v21 }
 0x256   :  { %v304_v24 = vpop.permute.xlu0 %303 }
 0x257   :  { %v309_v27 = vrot.slane %v304_v24, %v206_v58 }
 0x25a   :  { %v269_v22 = vld [vmem:[#allocation3] sm:$0xff] }
 0x25b   :  { %471 = vlog2.f32 %v269_v22 }
 0x25f   :  { %v470_v23 = vpop.eup %469 }
 0x260   :  { %v300_v25 = vmul.f32 0.6931472, %v470_v23 }
 0x262   :  { %v310_v29 = vadd.f32 %v309_v27, %v300_v25 }
 0x264   :  { %v311_v34 = vsel %vm179_vm4, %v310_v29, 0.0 }
 0x265   :  { %v472_v26 = vpop.eup %471  ;;  %v314_v35 = vsel %vm313_vm6, %v311_v34, 0.0 }
 0x266   :  { %v271_v28 = vmul.f32 0.6931472, %v472_v26 }
 0x268   :  { %v278_v32 = vadd.f32 %v362_v31, %v271_v28 }
 0x26a   :  { %v281_v33 = vsel %vm27_vm5, %v278_v32, 0.0 }
 0x26b   :  { %282 = vadd.xlane.f32.xlu1 %v281_v33 }
 0x26f   :  { %315 = vadd.xlane.f32.xlu1 %v314_v35 }
 0x2f8   :  { %v283_v36 = vpop.xlane.xlu1 %282 }
 0x2f9   :  { %v284_v37 = vrot.slane %v283_v36, 4 }
 0x2fb   :  { %v285_v38 = vadd.f32 %v284_v37, %v283_v36 }
 0x2fc   :  { %v316_v39 = vpop.xlane.xlu1 %315 }
 0x2fd   :  { %v286_v40 = vrot.slane %v285_v38, 2  ;;  %v317_v41 = vrot.slane %v316_v39, 4 }
 0x2ff   :  { %v318_v42 = vadd.f32 %v317_v41, %v316_v39  ;;  %v287_v43 = vadd.f32 %v286_v40, %v285_v38 }
 0x301   :  { %v319_v44 = vrot.slane %v318_v42, 2  ;;  %v288_v45 = vrot.slane %v287_v43, 1 }
 0x303   :  { %v320_v46 = vadd.f32 %v319_v44, %v318_v42  ;;  %v289_v47 = vadd.f32 %v288_v45, %v287_v43 }
 0x305   :  { %447 = vpush %v289_v47  ;;  %v321_v48 = vrot.slane %v320_v46, 1 }
 0x307   :  { %v322_v49 = vadd.f32 %v321_v48, %v320_v46 }
 0x309   :  { %449 = vpush %v322_v49 }
 0x336   :  { %s448_s0 = spop %447 }
 0x337   :  { %v291_v50 = vstv %s448_s0 }
 0x338   :  { %v292_v51 = vadd.f32 %v291_v50, %v280_v30 }
 0x33a   :  { %293 = vst.msk [vmem:[#allocation6] sm:$0x1] %vm18_vm2, %v292_v51  ;;  %s450_s1 = spop %449 }
 0x33b   :  { %v324_v53 = vstv %s450_s1 }
 0x341   :  { %v312_v52 = vld [vmem:[#allocation6] sm:$0x1] }
 0x342   :  { %v325_v54 = vadd.f32 %v324_v53, %v312_v52 }
 0x344   :  { %326 = vst.msk [vmem:[#allocation6] sm:$0x1] %vm18_vm2, %v325_v54 }
 0x34b   :  { %v329_v55 = vld [vmem:[#allocation6] sm:$0x1] }
 0x34c   :  { %330 = vst.msk [vmem:[#allocation7] sm:$0x1] %vm18_vm2, %v329_v55 }
 0x34d   :  { %484 = shalt.err (!%p481_p4)
}
 0x34e   :  { %s485_s21 = scalar_lea.hbm %s624_s2, 16 }
 0x34f   :  { %p486_p5 = scmp.ne.s32.totalorder %s624_s2, %s485_s21  ;;  %p489_p6 = scmp.lt.u32.totalorder %s485_s21, %s624_s2 }
 0x351   :  { %p491_p7 = pnand %p489_p6, %p486_p5 }
 0x353   :  { %494 = shalt.err (!%p491_p7)
}
 0x354   :  { %340 = dma.vmem_to_hbm [thread:$0]  %s338_s16, 16, %s624_s2, [#allocation8]  }
 0x355   :  { %495 = dma.done.wait [#allocation8], 16  }
 0x356   :  { %496 = vsyncadd [#allocation8], 4294967280 }
 0x357   :  { %344 = vsyncpa [#allocation8], 1 }

</bundles_post_ra>
